<compile_context>
chip_gen: v6e
topology: v6e:2x2x1
jax: 0.10.0
libtpu: 0.0.40
codegen_flags: <defaults>
</compile_context>

<pallas_src>
import jax
import jax.numpy as jnp
from jax import lax
from jax.experimental import pallas as pl
from jax.experimental.pallas import tpu as pltpu

# ----------------------------- model hyperparams -----------------------------
INPUT_CHANNELS = 4
INPUT_LENGTH = 16
LATENT_DIM = 8
NUM_CLASSES = 3
BATCH = 2

# derived lengths (mirrors Encoder.__init__ arithmetic and the actual forward)
L1 = INPUT_LENGTH              # conv1: k=3, s=1, p=1
L2 = (L1 - 2) // 2 + 1         # maxpool: k=2, s=2
L3 = L2                        # conv2: k=3, s=1, p=1
L5 = L3 - 1                    # conv3: k=2, s=1, p=0   (avg_pool2 is NOT used in forward)
FLAT = 32 * L5
HID = FLAT // 2

# ---------------------- packed weight-blob row offsets -----------------------
# every block starts on a multiple of 16 rows (bf16 sublane tile) and is 128
# lanes wide (zero padded); the kernel slices the true (K, N) sub-block.
W1_OFF, W1_ROWS = 0, 16              # real (12, 32)
W2_OFF, W2_ROWS = 16, 96             # real (96, 64)
W3_OFF, W3_ROWS = 112, 128           # real (128, 32)
WF1_OFF, WF1_ROWS = 240, FLAT        # real (224, 112), rows ordered (position, channel)
WF2_OFF, WF2_ROWS = 464, 128         # real (112, 8); zero rows 112+ kill sigmoid(0)=0.5 pads
WC1_OFF, WC1_ROWS = 592, 16          # real (8, 4)   (z lanes >= 8 are exactly zero)
WC2_OFF, WC2_ROWS = 608, 16          # real (4, 3)   (c1 lanes >= 4 are exactly zero)
TOTAL_ROWS = 624


def _leaky_relu(x, slope=0.1):
    return jnp.maximum(x, slope * x)


# --------------------------------- kernel ------------------------------------
def cae_kernel(xcol_ref, w_ref, b_ref, out_ref, pad_ref):
    f32, bf16 = jnp.float32, jnp.bfloat16
    b = out_ref.shape[0]
    two_bl = xcol_ref.shape[0]
    bl = two_bl // 2          # B * L2
    lp = bl // b              # L2 (conv2 input/output length)
    lo = lp - 1               # L5 (conv3 output length)

    # ---- conv1: one (2B*L2, 12) x (12, 32) MXU pass; MaxPool BEFORE bias/leaky ----
    w1 = w_ref[W1_OFF:W1_OFF + 3 * INPUT_CHANNELS, 0:32]              # (12, 32) bf16
    h1 = jnp.dot(xcol_ref[...], w1, preferred_element_type=f32)       # (2B*L2, 32)
    # rows [0:bl) hold the even conv1 output positions, [bl:2bl) the odd ones;
    # per-channel bias and monotone leaky_relu commute with max -> epilogue once.
    m = _leaky_relu(jnp.maximum(h1[0:bl], h1[bl:two_bl]) + b_ref[0:1, 0:32])  # (B*L2, 32)

    # ---- conv2 (k=3, p=1): flat bf16 pad scratch (zero boundary rows only), K=96 ----
    zrow = jnp.zeros((1, 32), bf16)
    for bi in range(b):
        base = bi * (lp + 2)
        pad_ref[base:base + 1, :] = zrow
        pad_ref[base + lp + 1:base + lp + 2, :] = zrow
        pad_ref[base + 1:base + 1 + lp, :] = m[bi * lp:(bi + 1) * lp, :].astype(bf16)
    col2 = jnp.concatenate(
        [jnp.concatenate([pad_ref[bi * (lp + 2) + t:bi * (lp + 2) + t + lp, :]
                          for t in range(3)], axis=-1)
         for bi in range(b)], axis=0)                                  # (B*L2, 96) bf16
    w2 = w_ref[W2_OFF:W2_OFF + W2_ROWS, 0:64]                         # (96, 64) bf16
    h2 = _leaky_relu(jnp.dot(col2, w2, preferred_element_type=f32) + b_ref[1:2, 0:64])

    # ---- conv3 (k=2, p=0): im2col K = 64 + 64 = 128 -> single full-depth MXU pass ----
    h2b = h2.astype(bf16)                                              # (B*L2, 64)
    col3 = jnp.concatenate(
        [jnp.concatenate([h2b[bi * lp + t:bi * lp + t + lo, :] for t in range(2)], axis=-1)
         for bi in range(b)], axis=0)                                  # (B*L5, 128) bf16
    w3 = w_ref[W3_OFF:W3_OFF + W3_ROWS, 0:32]                         # (128, 32) bf16
    h3 = _leaky_relu(jnp.dot(col3, w3, preferred_element_type=f32) + b_ref[2:3, 0:32])

    # ---- encoder_fc1 + sigmoid: single K=224 contraction over (position, channel) ----
    # TODO(synk): nn.Dropout(0.5) is implemented as identity (inference mode).
    h3b = h3.astype(bf16)                                              # (B*L5, 32)
    h3_flat = jnp.concatenate(
        [jnp.concatenate([h3b[bi * lo + l:bi * lo + l + 1, :] for l in range(lo)], axis=-1)
         for bi in range(b)], axis=0)                                  # (B, 224) bf16
    s = jax.nn.sigmoid(
        jnp.dot(h3_flat, w_ref[WF1_OFF:WF1_OFF + WF1_ROWS, :],
                preferred_element_type=f32) + b_ref[3:4, :])           # (B, 128)

    # ---- encoder_fc2 -> latent. WF2 rows 112+ are zero (kills sigmoid(0)=0.5 pad
    #      lanes of s); WF2 cols 8+ and bias pad lanes are zero -> z lanes >= 8 == 0. ----
    z = jnp.dot(s.astype(bf16), w_ref[WF2_OFF:WF2_OFF + WF2_ROWS, :],
                preferred_element_type=f32) + b_ref[4:5, :]            # (B, 128)

    # ---- classification head: two K=16 matmuls (z / c1 pad lanes are exactly zero) ----
    c1 = jnp.maximum(
        jnp.dot(z[:, 0:WC1_ROWS].astype(bf16), w_ref[WC1_OFF:WC1_OFF + WC1_ROWS, :],
                preferred_element_type=f32) + b_ref[5:6, :], 0.0)
    logits = jnp.dot(c1[:, 0:WC2_ROWS].astype(bf16), w_ref[WC2_OFF:WC2_OFF + WC2_ROWS, :],
                     preferred_element_type=f32) + b_ref[6:7, :]
    out_ref[...] = logits                                              # (B, 128) lane-dense


# --------------------------------- wrapper -----------------------------------
def classification_autoencoder(x_ncl, w_blob, b_blob):
    """x_ncl: (B, C, L) float32 (PyTorch NCL). Returns logits (B, NUM_CLASSES)."""
    bsz = x_ncl.shape[0]
    x_nlc = jnp.transpose(x_ncl, (0, 2, 1)).astype(jnp.float32)        # (B, L, C)
    x_pad = jnp.pad(x_nlc, ((0, 0), (1, 1), (0, 0)))                   # (B, L+2, C)
    # conv1 im2col (tap-major, channel-inner feature order), split into even/odd conv1
    # output positions on the leading axis so the kernel's MaxPool is one jnp.maximum,
    # flattened to the 2-D (2*B*L2, 12) layout the single conv1 MXU pass consumes.
    col = jnp.stack([x_pad[:, t:t + INPUT_LENGTH, :] for t in range(3)], axis=2)
    col = col.reshape(bsz, INPUT_LENGTH, 3 * INPUT_CHANNELS)           # (B, L, 12)
    xcol = jnp.concatenate([col[:, 0::2, :], col[:, 1::2, :]], axis=0)  # (2B, L2, 12)
    xcol = xcol.reshape(2 * bsz * L2, 3 * INPUT_CHANNELS).astype(jnp.bfloat16)

    vmem = pl.BlockSpec(memory_space=pltpu.MemorySpace.VMEM)
    out = pl.pallas_call(
        cae_kernel,
        out_shape=jax.ShapeDtypeStruct((bsz, 128), jnp.float32),
        in_specs=[vmem, vmem, vmem],
        out_specs=vmem,
        scratch_shapes=[pltpu.VMEM((bsz * (L2 + 2), 32), jnp.bfloat16)],
    )(xcol, w_blob, b_blob)
    return out[:, :NUM_CLASSES]


# ------------------------- parameter init (PyTorch-like) ---------------------
def _uniform(key, shape, fan_in):
    bound = 1.0 / jnp.sqrt(float(fan_in))
    return jax.random.uniform(key, shape, jnp.float32, -bound, bound)


def init_pytorch_params(key):
    """Parameters in PyTorch conventions/shapes."""
    ks = jax.random.split(key, 14)
    p = {}
    p["conv1_w"] = _uniform(ks[0], (32, INPUT_CHANNELS, 3), INPUT_CHANNELS * 3)
    p["conv1_b"] = _uniform(ks[1], (32,), INPUT_CHANNELS * 3)
    p["conv2_w"] = _uniform(ks[2], (64, 32, 3), 32 * 3)
    p["conv2_b"] = _uniform(ks[3], (64,), 32 * 3)
    p["conv3_w"] = _uniform(ks[4], (32, 64, 2), 64 * 2)
    p["conv3_b"] = _uniform(ks[5], (32,), 64 * 2)
    p["fc1_w"] = _uniform(ks[6], (HID, FLAT), FLAT)
    p["fc1_b"] = _uniform(ks[7], (HID,), FLAT)
    p["fc2_w"] = _uniform(ks[8], (LATENT_DIM, HID), HID)
    p["fc2_b"] = _uniform(ks[9], (LATENT_DIM,), HID)
    p["cls1_w"] = _uniform(ks[10], (4, LATENT_DIM), LATENT_DIM)
    p["cls1_b"] = _uniform(ks[11], (4,), LATENT_DIM)
    p["cls2_w"] = _uniform(ks[12], (NUM_CLASSES, 4), 4)
    p["cls2_b"] = _uniform(ks[13], (NUM_CLASSES,), 4)
    return p


def _block(mat, rows, cols=128):
    out = jnp.zeros((rows, cols), jnp.float32)
    return out.at[:mat.shape[0], :mat.shape[1]].set(mat)


def to_kernel_params(p):
    """Pack PyTorch-shaped params into one bf16 weight blob + one f32 bias blob."""
    # Blob layout invariants the kernel relies on (padded-lane correctness):
    #  * all blocks zero-padded to 128 lanes; WF2 rows >= HID are zero so the
    #    sigmoid(0)=0.5 pad lanes of s never leak into the latent;
    #  * WF2 cols >= LATENT_DIM and fc2 bias pad lanes are zero -> z lanes >= 8 are 0,
    #    which is what makes the 16-row WC1/WC2 head blocks sufficient.
    assert WF1_OFF + WF1_ROWS == WF2_OFF and WF2_OFF + WF2_ROWS == WC1_OFF
    assert WC1_OFF + WC1_ROWS == WC2_OFF and WC2_OFF + WC2_ROWS == TOTAL_ROWS
    assert HID < WF2_ROWS and LATENT_DIM <= WC1_ROWS and 4 <= WC2_ROWS
    assert all(off % 16 == 0 for off in
               (W1_OFF, W2_OFF, W3_OFF, WF1_OFF, WF2_OFF, WC1_OFF, WC2_OFF, TOTAL_ROWS))

    # conv weights -> im2col blocks with rows ordered (tap, in_channel)
    w1 = jnp.transpose(p["conv1_w"], (2, 1, 0)).reshape(3 * INPUT_CHANNELS, 32)
    w2 = jnp.transpose(p["conv2_w"], (2, 1, 0)).reshape(3 * 32, 64)
    w3 = jnp.transpose(p["conv3_w"], (2, 1, 0)).reshape(2 * 64, 32)
    # encoder_fc1: PyTorch flattens conv output as (channel, position); rearrange to
    # row order (position, channel) to match the kernel's h3_flat lane order l*32 + c.
    wf1 = p["fc1_w"].reshape(HID, 32, L5).transpose(2, 1, 0).reshape(L5 * 32, HID)
    wf2 = p["fc2_w"].T                                   # (HID, LATENT_DIM)
    wc1 = p["cls1_w"].T                                  # (LATENT_DIM, 4)
    wc2 = p["cls2_w"].T                                  # (4, NUM_CLASSES)

    w_blob = jnp.concatenate([
        _block(w1, W1_ROWS), _block(w2, W2_ROWS), _block(w3, W3_ROWS),
        _block(wf1, WF1_ROWS), _block(wf2, WF2_ROWS),
        _block(wc1, WC1_ROWS), _block(wc2, WC2_ROWS),
    ], axis=0).astype(jnp.bfloat16)
    assert w_blob.shape == (TOTAL_ROWS, 128)

    def brow(v):
        return jnp.zeros((128,), jnp.float32).at[:v.shape[0]].set(v)

    b_blob = jnp.stack([
        brow(p["conv1_b"]), brow(p["conv2_b"]), brow(p["conv3_b"]),
        brow(p["fc1_b"]), brow(p["fc2_b"]), brow(p["cls1_b"]), brow(p["cls2_b"]),
        jnp.zeros((128,), jnp.float32),
    ], axis=0)                                           # (8, 128) f32
    return w_blob, b_blob


# ----------------------- pure-JAX reference (PyTorch NCL) --------------------
def reference_forward(x_ncl, p):
    hi = lax.Precision.HIGHEST
    dn = ('NCH', 'OIH', 'NCH')

    def conv1d(x, w, b, pad):
        y = lax.conv_general_dilated(x, w, (1,), [(pad, pad)],
                                     dimension_numbers=dn, precision=hi)
        return y + b[None, :, None]

    def lrelu(v):
        return jnp.where(v > 0, v, 0.1 * v)

    h = lrelu(conv1d(x_ncl, p["conv1_w"], p["conv1_b"], 1))
    h = lax.reduce_window(h, -jnp.inf, lax.max, (1, 1, 2), (1, 1, 2), 'VALID')
    h = lrelu(conv1d(h, p["conv2_w"], p["conv2_b"], 1))
    h = lrelu(conv1d(h, p["conv3_w"], p["conv3_b"], 0))
    h = h.reshape(h.shape[0], -1)                               # (B, 32*L5), (c,l) order
    h = jax.nn.sigmoid(jnp.dot(h, p["fc1_w"].T, precision=hi) + p["fc1_b"])
    z = jnp.dot(h, p["fc2_w"].T, precision=hi) + p["fc2_b"]
    z = jnp.maximum(jnp.dot(z, p["cls1_w"].T, precision=hi) + p["cls1_b"], 0.0)
    return jnp.dot(z, p["cls2_w"].T, precision=hi) + p["cls2_b"]


# ----------------------------------- main -------------------------------------
if __name__ == "__main__":
    key = jax.random.PRNGKey(0)
    k_x, k_p = jax.random.split(key)
    x = jax.random.normal(k_x, (BATCH, INPUT_CHANNELS, INPUT_LENGTH), jnp.float32)

    pt_params = init_pytorch_params(k_p)
    w_blob, b_blob = to_kernel_params(pt_params)

    fwd = jax.jit(classification_autoencoder)
    logits = jax.block_until_ready(fwd(x, w_blob, b_blob))

    ref = jax.block_until_ready(reference_forward(x, pt_params))
    assert logits.shape == (BATCH, NUM_CLASSES)
    # bf16 matmul inputs with f32 accumulation -> slightly looser tolerance
    assert jnp.allclose(logits, ref, atol=2e-2, rtol=2e-2), (logits, ref)

    print("KERNEL_OK")
</pallas_src>

<mosaic_0001>
module attributes {stable_mosaic.version = 11 : i64} {
  func.func @cae_kernel(%arg0: memref<32x12xbf16, #tpu.memory_space<vmem>>, %arg1: memref<624x128xbf16, #tpu.memory_space<vmem>>, %arg2: memref<8x128xf32, #tpu.memory_space<vmem>>, %arg3: memref<2x128xf32, #tpu.memory_space<vmem>>, %arg4: memref<20x32xbf16, #tpu.memory_space<vmem>>) attributes {dimension_semantics = [], scalar_prefetch = 0 : i64, scratch_operands = 1 : i64, tpu.core_type = #tpu.core_type<tc>} {
    %c0 = arith.constant 0 : index
    %c0_0 = arith.constant 0 : index
    %0 = vector.load %arg1[%c0, %c0_0] : memref<624x128xbf16, #tpu.memory_space<vmem>>, vector<12x32xbf16>
    %c0_1 = arith.constant 0 : index
    %c0_2 = arith.constant 0 : index
    %1 = vector.load %arg0[%c0_1, %c0_2] : memref<32x12xbf16, #tpu.memory_space<vmem>>, vector<32x12xbf16>
    %cst = arith.constant dense<0.000000e+00> : vector<32x32xf32>
    %2 = tpu.matmul %1, %0, %cst {dimension_numbers = #tpu.dot_dimension_numbers<[1], [0], [0], [1], [0, 0, 1, 1], [], []>} : vector<32x12xbf16>, vector<12x32xbf16>, vector<32x32xf32> -> vector<32x32xf32>
    %3 = vector.extract_strided_slice %2 {offsets = [0, 0], sizes = [16, 32], strides = [1, 1]} : vector<32x32xf32> to vector<16x32xf32>
    %4 = vector.extract_strided_slice %2 {offsets = [16, 0], sizes = [16, 32], strides = [1, 1]} : vector<32x32xf32> to vector<16x32xf32>
    %5 = arith.maximumf %3, %4 : vector<16x32xf32>
    %c0_3 = arith.constant 0 : index
    %c0_4 = arith.constant 0 : index
    %6 = vector.load %arg2[%c0_3, %c0_4] : memref<8x128xf32, #tpu.memory_space<vmem>>, vector<1x32xf32>
    %7 = vector.broadcast %6 : vector<1x32xf32> to vector<16x32xf32>
    %8 = arith.addf %5, %7 : vector<16x32xf32>
    %cst_5 = arith.constant 1.000000e-01 : f32
    %9 = vector.broadcast %cst_5 : f32 to vector<16x32xf32>
    %10 = arith.mulf %9, %8 : vector<16x32xf32>
    %11 = arith.maximumf %8, %10 : vector<16x32xf32>
    %cst_6 = arith.constant 0.000000e+00 : bf16
    %12 = vector.broadcast %cst_6 : bf16 to vector<1x32xbf16>
    %c0_7 = arith.constant 0 : index
    %c0_8 = arith.constant 0 : index
    %13 = vector.load %arg4[%c0_7, %c0_8] : memref<20x32xbf16, #tpu.memory_space<vmem>>, vector<1x32xbf16>
    tpu.vector_store %arg4[%c0_7, %c0_8], %12 {strides = array<i32>} : memref<20x32xbf16, #tpu.memory_space<vmem>>, vector<1x32xbf16>,
    %c9 = arith.constant 9 : index
    %c0_9 = arith.constant 0 : index
    %14 = vector.load %arg4[%c9, %c0_9] : memref<20x32xbf16, #tpu.memory_space<vmem>>, vector<1x32xbf16>
    tpu.vector_store %arg4[%c9, %c0_9], %12 {strides = array<i32>} : memref<20x32xbf16, #tpu.memory_space<vmem>>, vector<1x32xbf16>,
    %15 = vector.extract_strided_slice %11 {offsets = [0, 0], sizes = [8, 32], strides = [1, 1]} : vector<16x32xf32> to vector<8x32xf32>
    %16 = arith.truncf %15 : vector<8x32xf32> to vector<8x32xbf16>
    %c1 = arith.constant 1 : index
    %c0_10 = arith.constant 0 : index
    %17 = vector.load %arg4[%c1, %c0_10] : memref<20x32xbf16, #tpu.memory_space<vmem>>, vector<8x32xbf16>
    tpu.vector_store %arg4[%c1, %c0_10], %16 {strides = array<i32>} : memref<20x32xbf16, #tpu.memory_space<vmem>>, vector<8x32xbf16>,
    %c10 = arith.constant 10 : index
    %c0_11 = arith.constant 0 : index
    %18 = vector.load %arg4[%c10, %c0_11] : memref<20x32xbf16, #tpu.memory_space<vmem>>, vector<1x32xbf16>
    tpu.vector_store %arg4[%c10, %c0_11], %12 {strides = array<i32>} : memref<20x32xbf16, #tpu.memory_space<vmem>>, vector<1x32xbf16>,
    %c19 = arith.constant 19 : index
    %c0_12 = arith.constant 0 : index
    %19 = vector.load %arg4[%c19, %c0_12] : memref<20x32xbf16, #tpu.memory_space<vmem>>, vector<1x32xbf16>
    tpu.vector_store %arg4[%c19, %c0_12], %12 {strides = array<i32>} : memref<20x32xbf16, #tpu.memory_space<vmem>>, vector<1x32xbf16>,
    %20 = vector.extract_strided_slice %11 {offsets = [8, 0], sizes = [8, 32], strides = [1, 1]} : vector<16x32xf32> to vector<8x32xf32>
    %21 = arith.truncf %20 : vector<8x32xf32> to vector<8x32xbf16>
    %c11 = arith.constant 11 : index
    %c0_13 = arith.constant 0 : index
    %22 = vector.load %arg4[%c11, %c0_13] : memref<20x32xbf16, #tpu.memory_space<vmem>>, vector<8x32xbf16>
    tpu.vector_store %arg4[%c11, %c0_13], %21 {strides = array<i32>} : memref<20x32xbf16, #tpu.memory_space<vmem>>, vector<8x32xbf16>,
    %c0_14 = arith.constant 0 : index
    %c0_15 = arith.constant 0 : index
    %23 = vector.load %arg4[%c0_14, %c0_15] : memref<20x32xbf16, #tpu.memory_space<vmem>>, vector<8x32xbf16>
    %c1_16 = arith.constant 1 : index
    %c0_17 = arith.constant 0 : index
    %24 = vector.load %arg4[%c1_16, %c0_17] : memref<20x32xbf16, #tpu.memory_space<vmem>>, vector<8x32xbf16>
    %c2 = arith.constant 2 : index
    %c0_18 = arith.constant 0 : index
    %25 = vector.load %arg4[%c2, %c0_18] : memref<20x32xbf16, #tpu.memory_space<vmem>>, vector<8x32xbf16>
    %26 = tpu.concatenate %23, %24, %25 in 1 : vector<8x32xbf16>, vector<8x32xbf16>, vector<8x32xbf16> -> vector<8x96xbf16>
    %c10_19 = arith.constant 10 : index
    %c0_20 = arith.constant 0 : index
    %27 = vector.load %arg4[%c10_19, %c0_20] : memref<20x32xbf16, #tpu.memory_space<vmem>>, vector<8x32xbf16>
    %c11_21 = arith.constant 11 : index
    %c0_22 = arith.constant 0 : index
    %28 = vector.load %arg4[%c11_21, %c0_22] : memref<20x32xbf16, #tpu.memory_space<vmem>>, vector<8x32xbf16>
    %c12 = arith.constant 12 : index
    %c0_23 = arith.constant 0 : index
    %29 = vector.load %arg4[%c12, %c0_23] : memref<20x32xbf16, #tpu.memory_space<vmem>>, vector<8x32xbf16>
    %30 = tpu.concatenate %27, %28, %29 in 1 : vector<8x32xbf16>, vector<8x32xbf16>, vector<8x32xbf16> -> vector<8x96xbf16>
    %31 = tpu.concatenate %26, %30 in 0 : vector<8x96xbf16>, vector<8x96xbf16> -> vector<16x96xbf16>
    %c16 = arith.constant 16 : index
    %c0_24 = arith.constant 0 : index
    %32 = vector.load %arg1[%c16, %c0_24] : memref<624x128xbf16, #tpu.memory_space<vmem>>, vector<96x64xbf16>
    %cst_25 = arith.constant dense<0.000000e+00> : vector<16x64xf32>
    %33 = tpu.matmul %31, %32, %cst_25 {dimension_numbers = #tpu.dot_dimension_numbers<[1], [0], [0], [1], [0, 0, 1, 1], [], []>} : vector<16x96xbf16>, vector<96x64xbf16>, vector<16x64xf32> -> vector<16x64xf32>
    %c1_26 = arith.constant 1 : index
    %c0_27 = arith.constant 0 : index
    %34 = vector.load %arg2[%c1_26, %c0_27] : memref<8x128xf32, #tpu.memory_space<vmem>>, vector<1x64xf32>
    %35 = vector.broadcast %34 : vector<1x64xf32> to vector<16x64xf32>
    %36 = arith.addf %33, %35 : vector<16x64xf32>
    %cst_28 = arith.constant 1.000000e-01 : f32
    %37 = vector.broadcast %cst_28 : f32 to vector<16x64xf32>
    %38 = arith.mulf %37, %36 : vector<16x64xf32>
    %39 = arith.maximumf %36, %38 : vector<16x64xf32>
    %40 = arith.truncf %39 : vector<16x64xf32> to vector<16x64xbf16>
    %41 = vector.extract_strided_slice %40 {offsets = [0, 0], sizes = [7, 64], strides = [1, 1]} : vector<16x64xbf16> to vector<7x64xbf16>
    %42 = vector.extract_strided_slice %40 {offsets = [1, 0], sizes = [7, 64], strides = [1, 1]} : vector<16x64xbf16> to vector<7x64xbf16>
    %43 = tpu.concatenate %41, %42 in 1 : vector<7x64xbf16>, vector<7x64xbf16> -> vector<7x128xbf16>
    %44 = vector.extract_strided_slice %40 {offsets = [8, 0], sizes = [7, 64], strides = [1, 1]} : vector<16x64xbf16> to vector<7x64xbf16>
    %45 = vector.extract_strided_slice %40 {offsets = [9, 0], sizes = [7, 64], strides = [1, 1]} : vector<16x64xbf16> to vector<7x64xbf16>
    %46 = tpu.concatenate %44, %45 in 1 : vector<7x64xbf16>, vector<7x64xbf16> -> vector<7x128xbf16>
    %47 = tpu.concatenate %43, %46 in 0 : vector<7x128xbf16>, vector<7x128xbf16> -> vector<14x128xbf16>
    %c112 = arith.constant 112 : index
    %c0_29 = arith.constant 0 : index
    %48 = vector.load %arg1[%c112, %c0_29] : memref<624x128xbf16, #tpu.memory_space<vmem>>, vector<128x32xbf16>
    %cst_30 = arith.constant dense<0.000000e+00> : vector<14x32xf32>
    %49 = tpu.matmul %47, %48, %cst_30 {dimension_numbers = #tpu.dot_dimension_numbers<[1], [0], [0], [1], [0, 0, 1, 1], [], []>} : vector<14x128xbf16>, vector<128x32xbf16>, vector<14x32xf32> -> vector<14x32xf32>
    %c2_31 = arith.constant 2 : index
    %c0_32 = arith.constant 0 : index
    %50 = vector.load %arg2[%c2_31, %c0_32] : memref<8x128xf32, #tpu.memory_space<vmem>>, vector<1x32xf32>
    %51 = vector.broadcast %50 : vector<1x32xf32> to vector<14x32xf32>
    %52 = arith.addf %49, %51 : vector<14x32xf32>
    %cst_33 = arith.constant 1.000000e-01 : f32
    %53 = vector.broadcast %cst_33 : f32 to vector<14x32xf32>
    %54 = arith.mulf %53, %52 : vector<14x32xf32>
    %55 = arith.maximumf %52, %54 : vector<14x32xf32>
    %56 = arith.truncf %55 : vector<14x32xf32> to vector<14x32xbf16>
    %57 = vector.extract_strided_slice %56 {offsets = [0, 0], sizes = [1, 32], strides = [1, 1]} : vector<14x32xbf16> to vector<1x32xbf16>
    %58 = vector.extract_strided_slice %56 {offsets = [1, 0], sizes = [1, 32], strides = [1, 1]} : vector<14x32xbf16> to vector<1x32xbf16>
    %59 = vector.extract_strided_slice %56 {offsets = [2, 0], sizes = [1, 32], strides = [1, 1]} : vector<14x32xbf16> to vector<1x32xbf16>
    %60 = vector.extract_strided_slice %56 {offsets = [3, 0], sizes = [1, 32], strides = [1, 1]} : vector<14x32xbf16> to vector<1x32xbf16>
    %61 = vector.extract_strided_slice %56 {offsets = [4, 0], sizes = [1, 32], strides = [1, 1]} : vector<14x32xbf16> to vector<1x32xbf16>
    %62 = vector.extract_strided_slice %56 {offsets = [5, 0], sizes = [1, 32], strides = [1, 1]} : vector<14x32xbf16> to vector<1x32xbf16>
    %63 = vector.extract_strided_slice %56 {offsets = [6, 0], sizes = [1, 32], strides = [1, 1]} : vector<14x32xbf16> to vector<1x32xbf16>
    %64 = tpu.concatenate %57, %58, %59, %60, %61, %62, %63 in 1 : vector<1x32xbf16>, vector<1x32xbf16>, vector<1x32xbf16>, vector<1x32xbf16>, vector<1x32xbf16>, vector<1x32xbf16>, vector<1x32xbf16> -> vector<1x224xbf16>
    %65 = vector.extract_strided_slice %56 {offsets = [7, 0], sizes = [1, 32], strides = [1, 1]} : vector<14x32xbf16> to vector<1x32xbf16>
    %66 = vector.extract_strided_slice %56 {offsets = [8, 0], sizes = [1, 32], strides = [1, 1]} : vector<14x32xbf16> to vector<1x32xbf16>
    %67 = vector.extract_strided_slice %56 {offsets = [9, 0], sizes = [1, 32], strides = [1, 1]} : vector<14x32xbf16> to vector<1x32xbf16>
    %68 = vector.extract_strided_slice %56 {offsets = [10, 0], sizes = [1, 32], strides = [1, 1]} : vector<14x32xbf16> to vector<1x32xbf16>
    %69 = vector.extract_strided_slice %56 {offsets = [11, 0], sizes = [1, 32], strides = [1, 1]} : vector<14x32xbf16> to vector<1x32xbf16>
    %70 = vector.extract_strided_slice %56 {offsets = [12, 0], sizes = [1, 32], strides = [1, 1]} : vector<14x32xbf16> to vector<1x32xbf16>
    %71 = vector.extract_strided_slice %56 {offsets = [13, 0], sizes = [1, 32], strides = [1, 1]} : vector<14x32xbf16> to vector<1x32xbf16>
    %72 = tpu.concatenate %65, %66, %67, %68, %69, %70, %71 in 1 : vector<1x32xbf16>, vector<1x32xbf16>, vector<1x32xbf16>, vector<1x32xbf16>, vector<1x32xbf16>, vector<1x32xbf16>, vector<1x32xbf16> -> vector<1x224xbf16>
    %73 = tpu.concatenate %64, %72 in 0 : vector<1x224xbf16>, vector<1x224xbf16> -> vector<2x224xbf16>
    %c240 = arith.constant 240 : index
    %c0_34 = arith.constant 0 : index
    %74 = vector.load %arg1[%c240, %c0_34] : memref<624x128xbf16, #tpu.memory_space<vmem>>, vector<224x128xbf16>
    %cst_35 = arith.constant dense<0.000000e+00> : vector<2x128xf32>
    %75 = tpu.matmul %73, %74, %cst_35 {dimension_numbers = #tpu.dot_dimension_numbers<[1], [0], [0], [1], [0, 0, 1, 1], [], []>} : vector<2x224xbf16>, vector<224x128xbf16>, vector<2x128xf32> -> vector<2x128xf32>
    %c3 = arith.constant 3 : index
    %c0_36 = arith.constant 0 : index
    %76 = vector.load %arg2[%c3, %c0_36] : memref<8x128xf32, #tpu.memory_space<vmem>>, vector<1x128xf32>
    %77 = vector.broadcast %76 : vector<1x128xf32> to vector<2x128xf32>
    %78 = arith.addf %75, %77 : vector<2x128xf32>
    %79 = arith.negf %78 : vector<2x128xf32>
    %80 = math.exp %79 : vector<2x128xf32>
    %cst_37 = arith.constant 1.000000e+00 : f32
    %81 = vector.broadcast %cst_37 : f32 to vector<2x128xf32>
    %82 = arith.addf %81, %80 : vector<2x128xf32>
    %83 = arith.divf %81, %82 : vector<2x128xf32>
    %84 = arith.truncf %83 : vector<2x128xf32> to vector<2x128xbf16>
    %c464 = arith.constant 464 : index
    %c0_38 = arith.constant 0 : index
    %85 = vector.load %arg1[%c464, %c0_38] : memref<624x128xbf16, #tpu.memory_space<vmem>>, vector<128x128xbf16>
    %cst_39 = arith.constant dense<0.000000e+00> : vector<2x128xf32>
    %86 = tpu.matmul %84, %85, %cst_39 {dimension_numbers = #tpu.dot_dimension_numbers<[1], [0], [0], [1], [0, 0, 1, 1], [], []>} : vector<2x128xbf16>, vector<128x128xbf16>, vector<2x128xf32> -> vector<2x128xf32>
    %c4 = arith.constant 4 : index
    %c0_40 = arith.constant 0 : index
    %87 = vector.load %arg2[%c4, %c0_40] : memref<8x128xf32, #tpu.memory_space<vmem>>, vector<1x128xf32>
    %88 = vector.broadcast %87 : vector<1x128xf32> to vector<2x128xf32>
    %89 = arith.addf %86, %88 : vector<2x128xf32>
    %90 = vector.extract_strided_slice %89 {offsets = [0, 0], sizes = [2, 16], strides = [1, 1]} : vector<2x128xf32> to vector<2x16xf32>
    %91 = arith.truncf %90 : vector<2x16xf32> to vector<2x16xbf16>
    %c592 = arith.constant 592 : index
    %c0_41 = arith.constant 0 : index
    %92 = vector.load %arg1[%c592, %c0_41] : memref<624x128xbf16, #tpu.memory_space<vmem>>, vector<16x128xbf16>
    %cst_42 = arith.constant dense<0.000000e+00> : vector<2x128xf32>
    %93 = tpu.matmul %91, %92, %cst_42 {dimension_numbers = #tpu.dot_dimension_numbers<[1], [0], [0], [1], [0, 0, 1, 1], [], []>} : vector<2x16xbf16>, vector<16x128xbf16>, vector<2x128xf32> -> vector<2x128xf32>
    %c5 = arith.constant 5 : index
    %c0_43 = arith.constant 0 : index
    %94 = vector.load %arg2[%c5, %c0_43] : memref<8x128xf32, #tpu.memory_space<vmem>>, vector<1x128xf32>
    %95 = vector.broadcast %94 : vector<1x128xf32> to vector<2x128xf32>
    %96 = arith.addf %93, %95 : vector<2x128xf32>
    %cst_44 = arith.constant 0.000000e+00 : f32
    %97 = vector.broadcast %cst_44 : f32 to vector<2x128xf32>
    %98 = arith.maximumf %96, %97 : vector<2x128xf32>
    %99 = vector.extract_strided_slice %98 {offsets = [0, 0], sizes = [2, 16], strides = [1, 1]} : vector<2x128xf32> to vector<2x16xf32>
    %100 = arith.truncf %99 : vector<2x16xf32> to vector<2x16xbf16>
    %c608 = arith.constant 608 : index
    %c0_45 = arith.constant 0 : index
    %101 = vector.load %arg1[%c608, %c0_45] : memref<624x128xbf16, #tpu.memory_space<vmem>>, vector<16x128xbf16>
    %cst_46 = arith.constant dense<0.000000e+00> : vector<2x128xf32>
    %102 = tpu.matmul %100, %101, %cst_46 {dimension_numbers = #tpu.dot_dimension_numbers<[1], [0], [0], [1], [0, 0, 1, 1], [], []>} : vector<2x16xbf16>, vector<16x128xbf16>, vector<2x128xf32> -> vector<2x128xf32>
    %c6 = arith.constant 6 : index
    %c0_47 = arith.constant 0 : index
    %103 = vector.load %arg2[%c6, %c0_47] : memref<8x128xf32, #tpu.memory_space<vmem>>, vector<1x128xf32>
    %104 = vector.broadcast %103 : vector<1x128xf32> to vector<2x128xf32>
    %105 = arith.addf %102, %104 : vector<2x128xf32>
    %c0_48 = arith.constant 0 : index
    %c0_49 = arith.constant 0 : index
    %106 = vector.load %arg3[%c0_48, %c0_49] : memref<2x128xf32, #tpu.memory_space<vmem>>, vector<2x128xf32>
    tpu.vector_store %arg3[%c0_48, %c0_49], %105 {strides = array<i32>} : memref<2x128xf32, #tpu.memory_space<vmem>>, vector<2x128xf32>,
    return
  }
}

</mosaic_0001>

<bundles_post_ra>
// kernel: classification_autoencoder.1
= control target key start
LH: loop header
LB: loop body
LE: loop exit
PB: predicated region body
PF: predicated region fallthrough
CT: control target
= control target key end

     0   :  { %8 = vsyncpa [#allocation4], 0  ;;  %s1393_s0 = inlined_call_operand.vmem [shape: bf16[32,12], index: 0, kind: input, shape index: {}]   ;;  %s1394_s1 = inlined_call_operand.hbm [shape: bf16[624,128], index: 1, kind: input, shape index: {}]   ;;  %s1395_s2 = inlined_call_operand.vmem [shape: f32[8,128], index: 2, kind: input, shape index: {}]   ;;  %s1396_s3 = inlined_call_operand.hbm [shape: f32[2,128], index: 3, kind: output, shape index: {}]  }
   0x1   :  { %9 = vsyncpa [#allocation5], 0  ;;  %s1248_s12 = smov [#allocation3]  }
   0x2   :  { %s17_s13 = sshll.u32 %s1248_s12, 4  ;;  %s18_s13 = int_to_ptr.vmem [resolvable:$true] %s17_s13 }
   0x3   :  { %s1212_s14 = scalar_lea.vmem %s18_s13, 4992  ;;  %p1217_p1 = scmp.lt.s32.totalorder %s18_s13, %s18_s13 }
   0x4   :  { %p1213_p0 = scmp.ne.s32.totalorder %s18_s13, %s1212_s14  ;;  %p1218_p2 = scmp.lt.s32.totalorder %s1212_s14, %s1212_s14 }
   0x6   :  { %p1219_p3 = por %p1218_p2, %p1217_p1 }
   0x8   :  { %p1220_p4 = pnand %p1219_p3, %p1213_p0 }
   0xa   :  { %1223 = shalt.err (!%p1220_p4)
}
   0xb   :  { %s1249_s15 = smov 64   ;;  %s1250_s16 = smov 4  }
   0xc   :  { %23 = dma.hbm_to_vmem [thread:$0]  %s1394_s1, 4992, %s18_s13, [#allocation4], %s1249_s15, %s1249_s15, %s1250_s16  }
   0xd   :  { %1244 = dma.done.wait [#allocation4], 4992  }
   0xe   :  { %1245 = vsyncadd [#allocation4], 4294962304  ;;  %vm58_vm0 = vcmask 1045504   ;;  %vm51_vm1 = vcmask 97280   ;;  %v1154_v0 = vld [vmem:[#allocation3] sm:$0x3f]  }
   0xf   :  { %v1155_v1 = vld [vmem:[%s1393_s0] sm:$0xff]   ;;  %1139 = vmatprep.subr.msk.bf16.mxu0 %vm58_vm0, %v1154_v0  ;;  %v60_v2 = vsel %vm58_vm0, %v1154_v0, 0  ;;  %v1156_v3 = vld [vmem:[%s1393_s0 + $0x8] sm:$0xff]   ;;  %vm124_vm2 = vcmask 253952   ;;  %vm125_vm3 = vsmask.f32 256 }
  0x10   :  { %1066 = vmatpush3.bf16.msra.mxu0 %v60_v2  ;;  %1067 = vmatprep.mubr.msk.bf16.mxu0 %vm51_vm1, %v1155_v1  ;;  %vm130_vm4 = vsmask.f32 7938  ;;  %vm1289_vm5 = vmand %vm124_vm2, %vm125_vm3  ;;  %v127_v5 = vld [vmem:[#allocation2] sm:$0x1]  ;;  %v132_v6 = vld [vmem:[#allocation2 + $0x4] sm:$0x1] }
  0x11   :  { %v128_v7 = vsel %vm1289_vm5, 0, %v127_v5  ;;  %vm131_vm6 = vmand %vm124_vm2, %vm130_vm4  ;;  %vm157_vm7 = vcmask 254977   ;;  %vm158_vm8 = vsmask.f32 1280  ;;  %v160_v9 = vld [vmem:[#allocation2 + $0x4] sm:$0x2] }
  0x12   :  { %129 = vst [vmem:[#allocation2] sm:$0x1] %v128_v7  ;;  %v133_v8 = vsel %vm131_vm6, 0, %v132_v6  ;;  %vm159_vm9 = vmand %vm157_vm7, %vm158_vm8  ;;  %vm163_vm10 = vsmask.f32 7942  ;;  %v1161_v13 = vld [vmem:[#allocation3 + $0x30] sm:$0xff]  }
  0x13   :  { %1068 = vmatmul.mubr.msk.bf16.vlgmr.msra.gmra.mxu0 %vm51_vm1, %v1156_v3  ;;  %134 = vst [vmem:[#allocation2 + $0x4] sm:$0x1] %v133_v8  ;;  %v161_v10 = vsel %vm159_vm9, 0, %v160_v9  ;;  %vm164_vm11 = vmand %vm157_vm7, %vm163_vm10  ;;  %v165_v11 = vld [vmem:[#allocation2 + $0x8] sm:$0x2]  ;;  %v1251_v14 = vmov 0.0  }
  0x14   :  { %162 = vst [vmem:[#allocation2 + $0x4] sm:$0x2] %v161_v10  ;;  %v166_v12 = vsel %vm164_vm11, 0, %v165_v11  ;;  %1071 = vmatprep.subr.bf16.mxu1 %v1251_v14  ;;  %1087 = vmatprep.subr.bf16.mxu0 %v1251_v14  ;;  %v1162_v15 = vld [vmem:[#allocation3 + $0x28] sm:$0xff]   ;;  %v1163_v16 = vld [vmem:[#allocation3 + $0x20] sm:$0xff]   ;;  %vm149_vm12 = vcmask 257024  }
  0x15   :  { %167 = vst [vmem:[#allocation2 + $0x8] sm:$0x2] %v166_v12  ;;  %1072 = vmatpush3.bf16.msra.mxu1 %v1161_v13  ;;  %v974_v19 = vld [vmem:[%s1395_s2] ss:$0 sm:$0xff]  ;;  %vm150_vm13 = vmand %vm149_vm12, %vm130_vm4  ;;  %vm183_vm14 = vcmask 257025   ;;  %vm188_vm15 = vcmask 254976  }
  0x16   :  { %1073 = vmatprep.subr.bf16.mxu1 %v1251_v14  ;;  %vm184_vm0 = vmand %vm183_vm14, %vm163_vm10  ;;  %v1164_v50 = vld [vmem:[#allocation3 + $0x18] sm:$0xff]   ;;  %v1166_v55 = vld [vmem:[#allocation3 + $0x10] sm:$0xff]   ;;  %s1252_s23 = smov 32   ;;  %vm1253_vm2 = vmmov 0   ;;  %vm216_vm4 = vcmask 261120   ;;  %vm257_vm6 = vcmask 1043456  }
  0x17   :  { %vm189_vm1 = vmand %vm188_vm15, %vm158_vm8  ;;  %v1167_v60 = vld [vmem:[#allocation3 + $0x8] sm:$0xff]   ;;  %1083 = vmatprep.mubr.msk.bf16.mxu1 %vm1253_vm2, %v1251_v14  ;;  %1103 = vmatprep.mubr.msk.bf16.mxu0 %vm1253_vm2, %v1251_v14  ;;  %vm313_vm7 = vcmask 785408   ;;  %vm382_vm8 = vsmask.f32 3328  ;;  %s1255_s28 = smov 96   ;;  %vm557_vm10 = vcmask 1040384  }
  0x18   :  { %vm383_vm9 = vmand %vm257_vm6, %vm382_vm8  ;;  %s1256_s10 = smov [#allocation6]  }
  0x19   :  { %1074 = vmatpush3.bf16.msra.mxu1 %v1162_v15  ;;  %v151_v35 = vld [vmem:[#allocation2] sm:$0xf]  ;;  %vm558_vm11 = vmand %vm557_vm10, %vm125_vm3  ;;  %vm851_vm3 = vcmask 130048   ;;  %s960_s11 = sshll.u32 %s1256_s10, 4  ;;  %s961_s11 = int_to_ptr.vmem [resolvable:$true] %s960_s11 }
  0x1a   :  { %1075 = vmatprep.subr.bf16.mxu1 %v1251_v14  ;;  %v154_v36 = vld [vmem:[#allocation2 + $0x4] sm:$0x1]  ;;  %s1224_s12 = scalar_lea.vmem %s961_s11, 32  ;;  %p1229_p6 = scmp.lt.s32.totalorder %s961_s11, %s961_s11 }
  0x1b   :  { %v185_v45 = vld [vmem:[#allocation2 + $0x4] sm:$0xe]  ;;  %p1225_p5 = scmp.ne.s32.totalorder %s961_s11, %s1224_s12  ;;  %p1230_p7 = scmp.lt.s32.totalorder %s1224_s12, %s1224_s12 }
  0x1c   :  { %v190_v47 = vld [vmem:[#allocation2 + $0x8] sm:$0x3] }
  0x1d   :  { %1076 = vmatpush3.bf16.msra.mxu1 %v1163_v16  ;;  %p1231_p8 = por %p1230_p7, %p1229_p6 }
  0x1e   :  { %1077 = vmatprep.subr.bf16.mxu1 %v1251_v14 }
  0x1f   :  { %p1232_p9 = pnand %p1231_p8, %p1225_p5 }
  0x21   :  { %1078 = vmatpush3.bf16.msra.mxu1 %v1164_v50 }
  0x22   :  { %1079 = vmatprep.subr.bf16.mxu1 %v1251_v14 }
  0x25   :  { %1080 = vmatpush3.bf16.msra.mxu1 %v1166_v55  ;;  %v1254_v55 = vmov 0  }
  0x26   :  { %1081 = vmatprep.subr.bf16.mxu1 %v1251_v14 }
  0x29   :  { %1082 = vmatpush3.bf16.msra.mxu1 %v1167_v60  ;;  %v1181_v60 = vld [vmem:[#allocation3 + $0x88] sm:$0xff]  }
  0x2a   :  { %681 = vmatprep.subr.bf16.mxu1 %v1254_v55 }
  0xd3   :  { %v1069_v17 = vpop.f32.mrf.mxu0 }
  0xd5   :  { %v96_v18 = vpop.f32.mrf.mxu0 }
  0xd6   :  { %v111_v20 = vmax.f32 %v96_v18, %v1069_v17 }
  0xd7   :  { %v1070_v21 = vpop.f32.mrf.mxu0 }
  0xd8   :  { %v118_v22 = vadd.f32 %v974_v19, %v111_v20 }
  0xd9   :  { %v99_v23 = vpop.f32.mrf.mxu0 }
  0xda   :  { %v120_v24 = vmul.f32 0.1, %v118_v22  ;;  %v112_v25 = vmax.f32 %v99_v23, %v1070_v21  ;;  %v1168_v23 = vld [vmem:[#allocation3 + $0x70] sm:$0xff]  }
  0xdb   :  { %1088 = vmatpush3.bf16.msra.mxu0 %v1168_v23 }
  0xdc   :  { %v122_v26 = vmax.f32 %v118_v22, %v120_v24  ;;  %v119_v27 = vadd.f32 %v974_v19, %v112_v25  ;;  %v1169_v24 = vld [vmem:[#allocation3 + $0x68] sm:$0xff]   ;;  %1089 = vmatprep.subr.bf16.mxu0 %v1251_v14  ;;  %v1170_v25 = vld [vmem:[#allocation3 + $0x60] sm:$0xff]  }
  0xde   :  { %v1031_v28 = vpack.c.bf16 %v122_v26, %v122_v26  ;;  %v121_v29 = vmul.f32 0.1, %v119_v27  ;;  %v1171_v26 = vld [vmem:[#allocation3 + $0x58] sm:$0xff]  }
  0xdf   :  { %1090 = vmatpush3.bf16.msra.mxu0 %v1169_v24 }
  0xe0   :  { %v140_v30 = vshrl.u32 %v1031_v28, 16  ;;  %v123_v31 = vmax.f32 %v119_v27, %v121_v29  ;;  %v143_v33 = vshll.u32 %v1031_v28, 16  ;;  %1091 = vmatprep.subr.bf16.mxu0 %v1251_v14  ;;  %v1172_v27 = vld [vmem:[#allocation3 + $0x50] sm:$0xff]   ;;  %v1173_v28 = vld [vmem:[#allocation3 + $0x48] sm:$0xff]  }
  0xe1   :  { %v982_v29 = vld [vmem:[%s1395_s2 + $0x1] ss:$0 sm:$0xff] }
  0xe2   :  { %v142_v32 = vrot.slane %v140_v30, 7  ;;  %v1032_v34 = vpack.c.bf16 %v123_v31, %v123_v31 }
  0xe3   :  { %1092 = vmatpush3.bf16.msra.mxu0 %v1170_v25 }
  0xe4   :  { %v145_v37 = vor.u32 %v143_v33, %v142_v32  ;;  %v146_v38 = vrot.slane %v142_v32, 4  ;;  %v173_v39 = vshrl.u32 %v1032_v34, 16  ;;  %v176_v40 = vshll.u32 %v1032_v34, 16  ;;  %1093 = vmatprep.subr.bf16.mxu0 %v1251_v14 }
  0xe6   :  { %v152_v41 = vsel %vm150_vm13, %v145_v37, %v151_v35  ;;  %v155_v42 = vsel %vm1289_vm5, %v146_v38, %v154_v36  ;;  %v175_v43 = vrot.slane %v173_v39, 6  ;;  %v178_v44 = vrot.slane %v176_v40, 7  ;;  %v1174_v36 = vld [vmem:[#allocation3 + $0x40] sm:$0xff]  }
  0xe7   :  { %153 = vst [vmem:[#allocation2] sm:$0xf] %v152_v41  ;;  %156 = vst [vmem:[#allocation2 + $0x4] sm:$0x1] %v155_v42  ;;  %vm220_vm5 = vcmask 523264   ;;  %1094 = vmatpush3.bf16.msra.mxu0 %v1171_v26  ;;  %v1175_v41 = vld [vmem:[#allocation3 + $0x38] sm:$0xff]  }
  0xe8   :  { %v179_v46 = vor.u32 %v178_v44, %v175_v43  ;;  %1095 = vmatprep.subr.bf16.mxu0 %v1251_v14 }
  0xea   :  { %v180_v48 = vrot.slane %v179_v46, 4  ;;  %v186_v49 = vsel %vm184_vm0, %v179_v46, %v185_v45 }
  0xeb   :  { %187 = vst [vmem:[#allocation2 + $0x4] sm:$0xe] %v186_v49  ;;  %1096 = vmatpush3.bf16.msra.mxu0 %v1172_v27 }
  0xec   :  { %v191_v51 = vsel %vm189_vm1, %v180_v48, %v190_v47  ;;  %1097 = vmatprep.subr.bf16.mxu0 %v1251_v14 }
  0xed   :  { %192 = vst [vmem:[#allocation2 + $0x8] sm:$0x3] %v191_v51 }
  0xee   :  { %v193_v52 = vld [vmem:[#allocation2] sm:$0xf]  ;;  %v194_v53 = vld [vmem:[#allocation2 + $0x4] sm:$0x1] }
  0xef   :  { %v977_v54 = vcombine.low %v193_v52, %v194_v53  ;;  %v195_v57 = vld [vmem:[#allocation2] sm:$0xe]  ;;  %1098 = vmatpush3.bf16.msra.mxu0 %v1173_v28 }
  0xf0   :  { %v978_v0 = vcombine.low %v195_v57, %v194_v53  ;;  %1099 = vmatprep.subr.bf16.mxu0 %v1251_v14  ;;  %v1178_v57 = vld [vmem:[#allocation3 + $0xa0] sm:$0xff]  }
  0xf1   :  { %v204_v56 = vshll.u32 %v977_v54, 16  ;;  %v202_v58 = vshrl.u32 %v977_v54, 16  ;;  %v1176_v54 = vld [vmem:[#allocation3 + $0xb0] sm:$0xff]  }
  0xf2   :  { %v223_v61 = vld [vmem:[#allocation2 + $0x4] sm:$0xe]  ;;  %v213_v3 = vrot.slane %v978_v0, 1 }
  0xf3   :  { %v206_v59 = vrot.slane %v204_v56, 1  ;;  %v226_v6 = vld [vmem:[#allocation2 + $0x4] sm:$0xc]  ;;  %1100 = vmatpush3.bf16.msra.mxu0 %v1174_v36  ;;  %v1177_v56 = vld [vmem:[#allocation3 + $0xa8] sm:$0xff]  }
  0xf4   :  { %v225_v62 = vld [vmem:[#allocation2 + $0x8] sm:$0x3]  ;;  %1101 = vmatprep.subr.bf16.mxu0 %v1251_v14 }
  0xf5   :  { %v207_v63 = vor.u32 %v206_v59, %v202_v58  ;;  %v980_v1 = vcombine.low %v223_v61, %v225_v62  ;;  %v981_v8 = vcombine.low %v226_v6, %v225_v62  ;;  %v224_v11 = vld [vmem:[#allocation2 + $0x8] sm:$0x1]  ;;  %v1180_v59 = vld [vmem:[#allocation3 + $0x90] sm:$0xff]  }
  0xf6   :  { %v979_v13 = vcombine.low %v223_v61, %v224_v11  ;;  %v1179_v58 = vld [vmem:[#allocation3 + $0x98] sm:$0xff]   ;;  %v1182_v61 = vld [vmem:[#allocation3 + $0x80] sm:$0xff]  }
  0xf7   :  { %208 = vrot.lane.b32.xlu1 %v207_v63, %s1252_s23  ;;  %v238_v2 = vshll.u32 %v980_v1, 16  ;;  %v236_v4 = vshrl.u32 %v980_v1, 16  ;;  %v247_v9 = vrot.slane %v981_v8, 1  ;;  %1102 = vmatpush3.bf16.msra.mxu0 %v1175_v41  ;;  %v1183_v62 = vld [vmem:[#allocation3 + $0x78] sm:$0xff]   ;;  %v1184_v63 = vld [vmem:[#allocation3 + $0xe0] sm:$0xff]   ;;  %v1186_v1 = vld [vmem:[#allocation3 + $0xd0] sm:$0xff]  }
  0xf8   :  { %1107 = vmatprep.subr.bf16.mxu0 %v1251_v14  ;;  %v1185_v0 = vld [vmem:[#allocation3 + $0xd8] sm:$0xff]  }
  0xf9   :  { %v240_v5 = vrot.slane %v238_v2, 1  ;;  %v990_v2 = vld [vmem:[%s1395_s2 + $0x2] ss:$0 sm:$0xff] }
  0xfb   :  { %214 = vrot.lane.b32.xlu1 %v213_v3, %s1249_s15  ;;  %v241_v7 = vor.u32 %v240_v5, %v236_v4  ;;  %v1187_v5 = vld [vmem:[#allocation3 + $0xc8] sm:$0xff]  }
  0xfd   :  { %242 = vrot.lane.b32.xlu0 %v241_v7, %s1252_s23 }
 0x101   :  { %248 = vrot.lane.b32.xlu0 %v247_v9, %s1249_s15 }
 0x169   :  { %v209_v10 = vpop.permute.xlu1 %208 }
 0x16a   :  { %v219_v19 = vsel %vm216_vm4, %v193_v52, %v209_v10 }
 0x16d   :  { %v215_v15 = vpop.permute.xlu1 %214 }
 0x16e   :  { %v222_v21 = vsel %vm220_vm5, %v219_v19, %v215_v15 }
 0x16f   :  { %v243_v12 = vpop.permute.xlu0 %242 }
 0x170   :  { %v252_v16 = vsel %vm216_vm4, %v979_v13, %v243_v12  ;;  %v1188_v12 = vld [vmem:[#allocation3 + $0xc0] sm:$0xff]  }
 0x173   :  { %v249_v17 = vpop.permute.xlu0 %248 }
 0x174   :  { %v254_v18 = vsel %vm220_vm5, %v252_v16, %v249_v17  ;;  %v1189_v17 = vld [vmem:[#allocation3 + $0xb8] sm:$0xff]  }
 0x175   :  { %v256_v20 = vrot.slane %v254_v18, 5 }
 0x177   :  { %v259_v22 = vsel %vm257_vm6, %v222_v21, %v256_v20 }
 0x178   :  { %1084 = vmatmul.mubr.msk.bf16.vlgmr.msra.gmra.mxu1 %vm313_vm7, %v259_v22 }
 0x179   :  { %682 = vmatpush1.bf16.msra.mxu1 %v1176_v54  ;;  %v1192_v54 = vld [vmem:[#allocation3 + $0x110] sm:$0xff]  }
 0x17a   :  { %683 = vmatprep.subr.bf16.mxu1 %v1254_v55 }
 0x17d   :  { %684 = vmatpush1.bf16.msra.mxu1 %v1177_v56  ;;  %v1194_v56 = vld [vmem:[#allocation3 + $0x100] sm:$0xff]  }
 0x17e   :  { %685 = vmatprep.subr.bf16.mxu1 %v1254_v55 }
 0x181   :  { %686 = vmatpush1.bf16.msra.mxu1 %v1178_v57  ;;  %v1195_v57 = vld [vmem:[#allocation3 + $0xf8] sm:$0xff]  }
 0x182   :  { %687 = vmatprep.subr.bf16.mxu1 %v1254_v55 }
 0x185   :  { %688 = vmatpush1.bf16.msra.mxu1 %v1179_v58  ;;  %v1196_v58 = vld [vmem:[#allocation3 + $0xf0] sm:$0xff]  }
 0x186   :  { %689 = vmatprep.subr.bf16.mxu1 %v1254_v55 }
 0x189   :  { %690 = vmatpush1.bf16.msra.mxu1 %v1180_v59  ;;  %v1197_v59 = vld [vmem:[#allocation3 + $0xe8] sm:$0xff]  }
 0x18a   :  { %691 = vmatprep.subr.bf16.mxu1 %v1254_v55 }
 0x18d   :  { %692 = vmatpush1.bf16.msra.mxu1 %v1181_v60  ;;  %v999_v60 = vld [vmem:[%s1395_s2 + $0x3] ss:$0 sm:$0xff] }
 0x18e   :  { %693 = vmatprep.subr.bf16.mxu1 %v1254_v55 }
 0x191   :  { %694 = vmatpush1.bf16.msra.mxu1 %v1182_v61 }
 0x192   :  { %695 = vmatprep.subr.bf16.mxu1 %v1254_v55 }
 0x195   :  { %696 = vmatpush1.bf16.msra.mxu1 %v1183_v62 }
 0x196   :  { %701 = vmatprep.subr.bf16.mxu1 %v1254_v55 }
 0x199   :  { %702 = vmatpush2.bf16.msra.mxu1 %v1184_v63 }
 0x19a   :  { %703 = vmatprep.subr.bf16.mxu1 %v1254_v55 }
 0x19d   :  { %704 = vmatpush2.bf16.msra.mxu1 %v1185_v0 }
 0x19e   :  { %705 = vmatprep.subr.bf16.mxu1 %v1254_v55 }
 0x1a1   :  { %706 = vmatpush2.bf16.msra.mxu1 %v1186_v1 }
 0x1a2   :  { %707 = vmatprep.subr.bf16.mxu1 %v1254_v55 }
 0x1a5   :  { %708 = vmatpush2.bf16.msra.mxu1 %v1187_v5 }
 0x1a6   :  { %709 = vmatprep.subr.bf16.mxu1 %v1254_v55 }
 0x1a9   :  { %710 = vmatpush2.bf16.msra.mxu1 %v1188_v12  ;;  %v1199_v12 = vld [vmem:[#allocation3 + $0x130] sm:$0xff]  }
 0x1aa   :  { %711 = vmatprep.subr.bf16.mxu1 %v1254_v55  ;;  %v1193_v55 = vld [vmem:[#allocation3 + $0x108] sm:$0xff]  }
 0x1ad   :  { %712 = vmatpush2.bf16.msra.mxu1 %v1189_v17  ;;  %v1025_v17 = vld [vmem:[%s1395_s2 + $0x5] ss:$0 sm:$0xff] }
 0x238   :  { %v350_v30 = vpop.f32.mrf.mxu1 }
 0x239   :  { %v351_v31 = vadd.f32 %v982_v29, %v350_v30 }
 0x23a   :  { %v1085_v32 = vpop.f32.mrf.mxu1 }
 0x23b   :  { %v357_v34 = vmul.f32 0.1, %v351_v31 }
 0x23c   :  { %v353_v33 = vpop.f32.mrf.mxu1 }
 0x23d   :  { %v354_v35 = vadd.f32 %v982_v29, %v353_v33  ;;  %v359_v39 = vmax.f32 %v351_v31, %v357_v34 }
 0x23e   :  { %v1086_v37 = vpop.f32.mrf.mxu1 }
 0x23f   :  { %v358_v38 = vmul.f32 0.1, %v354_v35 }
 0x241   :  { %v360_v40 = vmax.f32 %v354_v35, %v358_v38 }
 0x243   :  { %v361_v42 = vpack.c.bf16 %v360_v40, %v359_v39 }
 0x245   :  { %v365_v43 = vshll.u32 %v361_v42, 16  ;;  %v363_v44 = vshrl.u32 %v361_v42, 16 }
 0x247   :  { %v367_v45 = vrot.slane %v365_v43, 1 }
 0x249   :  { %v368_v46 = vor.u32 %v367_v45, %v363_v44 }
 0x24b   :  { %369 = vrot.lane.b32.xlu0 %v368_v46, %s1249_s15 }
 0x2bd   :  { %v370_v47 = vpop.permute.xlu0 %369 }
 0x2be   :  { %v372_v48 = vsel %vm220_vm5, %v361_v42, %v370_v47 }
 0x2bf   :  { %v376_v49 = vshll.u32 %v372_v48, 16  ;;  %v374_v50 = vshrl.u32 %v372_v48, 16 }
 0x2c1   :  { %v378_v51 = vrot.slane %v376_v49, 1 }
 0x2c3   :  { %v379_v52 = vor.u32 %v378_v51, %v374_v50 }
 0x2c5   :  { %v384_v53 = vsel %vm383_vm9, %v372_v48, %v379_v52  ;;  %v1190_v52 = vld [vmem:[#allocation3 + $0x120] sm:$0xff]  }
 0x2c6   :  { %1104 = vmatmul.mubr.bf16.vlgmr.msra.gmra.mxu0 %v384_v53  ;;  %v1191_v53 = vld [vmem:[#allocation3 + $0x118] sm:$0xff]  }
 0x2c7   :  { %1123 = vmatprep.mubr.msk.bf16.mxu0 %vm1253_vm2, %v1251_v14  ;;  %1108 = vmatpush3.bf16.msra.mxu0 %v1190_v52 }
 0x2c8   :  { %1109 = vmatprep.subr.bf16.mxu0 %v1251_v14 }
 0x2cb   :  { %1110 = vmatpush3.bf16.msra.mxu0 %v1191_v53 }
 0x2cc   :  { %1111 = vmatprep.subr.bf16.mxu0 %v1251_v14 }
 0x2cf   :  { %1112 = vmatpush3.bf16.msra.mxu0 %v1192_v54 }
 0x2d0   :  { %1113 = vmatprep.subr.bf16.mxu0 %v1251_v14 }
 0x2d3   :  { %1114 = vmatpush3.bf16.msra.mxu0 %v1193_v55 }
 0x2d4   :  { %1115 = vmatprep.subr.bf16.mxu0 %v1251_v14 }
 0x2d7   :  { %1116 = vmatpush3.bf16.msra.mxu0 %v1194_v56 }
 0x2d8   :  { %1117 = vmatprep.subr.bf16.mxu0 %v1251_v14 }
 0x2db   :  { %1118 = vmatpush3.bf16.msra.mxu0 %v1195_v57 }
 0x2dc   :  { %1119 = vmatprep.subr.bf16.mxu0 %v1251_v14 }
 0x2df   :  { %1120 = vmatpush3.bf16.msra.mxu0 %v1196_v58 }
 0x2e0   :  { %1121 = vmatprep.subr.bf16.mxu0 %v1251_v14 }
 0x2e3   :  { %1122 = vmatpush3.bf16.msra.mxu0 %v1197_v59 }
 0x2e4   :  { %1127 = vmatprep.subr.bf16.mxu0 %v1251_v14 }
 0x386   :  { %v488_v3 = vpop.f32.mrf.mxu0 }
 0x387   :  { %v489_v4 = vadd.f32 %v990_v2, %v488_v3 }
 0x388   :  { %v1105_v6 = vpop.f32.mrf.mxu0 }
 0x389   :  { %v495_v8 = vmul.f32 0.1, %v489_v4  ;;  %v1198_v6 = vld [vmem:[#allocation3 + $0x128] sm:$0xff]  }
 0x38a   :  { %v491_v7 = vpop.f32.mrf.mxu0 }
 0x38b   :  { %v492_v9 = vadd.f32 %v990_v2, %v491_v7  ;;  %v497_v13 = vmax.f32 %v489_v4, %v495_v8  ;;  %v1016_v8 = vld [vmem:[%s1395_s2 + $0x4] ss:$0 sm:$0xff] }
 0x38c   :  { %v1106_v10 = vpop.f32.mrf.mxu0 }
 0x38d   :  { %v496_v11 = vmul.f32 0.1, %v492_v9 }
 0x38f   :  { %v498_v15 = vmax.f32 %v492_v9, %v496_v11 }
 0x391   :  { %v499_v16 = vpack.c.bf16 %v498_v15, %v497_v13 }
 0x393   :  { %v516_v18 = vrot.slane %v499_v16, 3  ;;  %v506_v19 = vrot.slane %v499_v16, 1  ;;  %v532_v20 = vshll.u32 %v499_v16, 16  ;;  %v501_v24 = vshrl.u32 %v499_v16, 16 }
 0x394   :  { %v512_v34 = vrot.slane %v499_v16, 2 }
 0x395   :  { %517 = vrot.lane.b32.xlu1 %v516_v18, %s1249_s15  ;;  %507 = vrot.lane.b32.xlu0 %v506_v19, %s1249_s15  ;;  %v534_v21 = vrot.slane %v532_v20, 1  ;;  %v540_v22 = vrot.slane %v532_v20, 3  ;;  %v537_v25 = vrot.slane %v532_v20, 2  ;;  %v513_v26 = vrot.slane %v501_v24, 2 }
 0x396   :  { %v509_v27 = vrot.slane %v501_v24, 1 }
 0x397   :  { %v1149_v23 = vpack.i.bf16 %v540_v22, %v534_v21 }
 0x399   :  { %1150 = vrot.lane.b32.xlu1 %v1149_v23, %s1252_s23  ;;  %503 = vrot.lane.b32.xlu0 %v501_v24, %s1252_s23 }
 0x39d   :  { %538 = vrot.lane.b32.xlu0 %v537_v25, %s1255_s28  ;;  %514 = vrot.lane.b32.xlu1 %v513_v26, %s1252_s23  ;;  %v1028_v25 = vld [vmem:[%s1395_s2 + $0x6] ss:$0 sm:$0xff] }
 0x3a1   :  { %510 = vrot.lane.b32.xlu1 %v509_v27, %s1255_s28 }
 0x407   :  { %v518_v28 = vpop.permute.xlu1 %517  ;;  %v508_v29 = vpop.permute.xlu0 %507 }
 0x40b   :  { %v1151_v30 = vpop.permute.xlu1 %1150  ;;  %v504_v31 = vpop.permute.xlu0 %503 }
 0x40c   :  { %v1153_v32 = vunpack.i.h.bf16 %v1151_v30  ;;  %v1152_v33 = vunpack.i.l.bf16 %v1151_v30  ;;  %v520_v41 = vsel %vm216_vm4, %v499_v16, %v504_v31 }
 0x40d   :  { %v522_v48 = vsel %vm220_vm5, %v520_v41, %v508_v29 }
 0x40e   :  { %v549_v35 = vsel %vm216_vm4, %v512_v34, %v1153_v32  ;;  %v544_v36 = vsel %vm216_vm4, %v499_v16, %v1152_v33 }
 0x40f   :  { %v545_v37 = vsel %vm220_vm5, %v544_v36, %v508_v29  ;;  %v539_v38 = vpop.permute.xlu0 %538  ;;  %v515_v39 = vpop.permute.xlu1 %514  ;;  %v550_v40 = vsel %vm220_vm5, %v549_v35, %v518_v28 }
 0x410   :  { %v547_v42 = vsel %vm313_vm7, %v545_v37, %v539_v38  ;;  %v528_v43 = vsel %vm216_vm4, %v512_v34, %v515_v39  ;;  %v554_v44 = vrot.slane %v550_v40, 3 }
 0x411   :  { %v530_v45 = vsel %vm220_vm5, %v528_v43, %v518_v28  ;;  %v553_v47 = vrot.slane %v547_v42, 3 }
 0x412   :  { %v560_v46 = vsel %vm558_vm11, %v530_v45, %v554_v44 }
 0x413   :  { %1014 = vmatprep.mubr.msk.bf16.mxu1 %vm313_vm7, %v560_v46  ;;  %v511_v49 = vpop.permute.xlu1 %510 }
 0x414   :  { %v524_v50 = vsel %vm313_vm7, %v522_v48, %v511_v49 }
 0x415   :  { %v559_v51 = vsel %vm558_vm11, %v524_v50, %v553_v47 }
 0x416   :  { %714 = vmatmul.mubr.bf16.vlgmr.msra.gmra.mxu1 %v559_v51 }
 0x4d6   :  { %v715_v61 = vpop.f32.mrf.mxu1 }
 0x4d7   :  { %v716_v62 = vadd.f32 %v999_v60, %v715_v61 }
 0x4d8   :  { %v717_v63 = vpop.f32.mrf.mxu1 }
 0x4d9   :  { %v1015_v0 = vmul.f32 -1.442695, %v716_v62 }
 0x4da   :  { %v718_v1 = vpop.f32.mrf.mxu1 }
 0x4db   :  { %1200 = vpow2.f32 %v1015_v0 }
 0x4dc   :  { %v719_v2 = vpop.f32.mrf.mxu1 }
 0x4e8   :  { %v1201_v3 = vpop.eup %1200 }
 0x4e9   :  { %v724_v4 = vadd.f32 1.0, %v1201_v3 }
 0x4eb   :  { %1202 = vrcp.f32 %v724_v4 }
 0x4f8   :  { %v1203_v5 = vpop.eup %1202 }
 0x4f9   :  { %v727_v7 = vpack.c.bf16 %v1203_v5, %v1203_v5 }
 0x4fb   :  { %1124 = vmatmul.mubr.bf16.vlgmr.msra.gmra.mxu0 %v727_v7 }
 0x4fc   :  { %1128 = vmatpush3.bf16.msra.mxu0 %v1198_v6  ;;  %1129 = vmatprep.mubr.msk.bf16.mxu0 %vm1253_vm2, %v1251_v14 }
 0x4fd   :  { %1133 = vmatprep.subr.bf16.mxu0 %v1251_v14 }
 0x5bb   :  { %v831_v9 = vpop.f32.mrf.mxu0 }
 0x5bc   :  { %v832_v10 = vadd.f32 %v1016_v8, %v831_v9 }
 0x5bd   :  { %v1125_v11 = vpop.f32.mrf.mxu0 }
 0x5be   :  { %v837_v13 = vpack.c.bf16 %v832_v10, %v832_v10 }
 0x5bf   :  { %v834_v15 = vpop.f32.mrf.mxu0 }
 0x5c0   :  { %1130 = vmatmul.mubr.msk.bf16.vlgmr.msra.gmra.mxu0 %vm851_vm3, %v837_v13 }
 0x5c1   :  { %v1126_v16 = vpop.f32.mrf.mxu0  ;;  %1134 = vmatpush3.bf16.msra.mxu0 %v1199_v12  ;;  %1135 = vmatprep.mubr.msk.bf16.mxu0 %vm1253_vm2, %v1251_v14 }
 0x680   :  { %v889_v18 = vpop.f32.mrf.mxu0 }
 0x681   :  { %v890_v19 = vadd.f32 %v1025_v17, %v889_v18 }
 0x682   :  { %v1131_v20 = vpop.f32.mrf.mxu0 }
 0x683   :  { %v895_v21 = vmax.f32 %v890_v19, 0.0 }
 0x684   :  { %v892_v22 = vpop.f32.mrf.mxu0 }
 0x685   :  { %v896_v23 = vpack.c.bf16 %v895_v21, %v895_v21 }
 0x686   :  { %v1132_v24 = vpop.f32.mrf.mxu0 }
 0x687   :  { %1136 = vmatmul.mubr.msk.bf16.vlgmr.msra.gmra.mxu0 %vm851_vm3, %v896_v23 }
 0x747   :  { %v947_v14 = vpop.f32.mrf.mxu0 }
 0x748   :  { %v948_v26 = vadd.f32 %v1028_v25, %v947_v14 }
 0x749   :  { %v1137_v27 = vpop.f32.mrf.mxu0 }
 0x74a   :  { %953 = vst [vmem:[#allocation6] sm:$0x3] %v948_v26 }
 0x74b   :  { %v950_v28 = vpop.f32.mrf.mxu0 }
 0x74c   :  { %1235 = shalt.err (!%p1232_p9)
}
 0x74d   :  { %963 = dma.vmem_to_hbm [thread:$0]  %s961_s11, 32, %s1396_s3, [#allocation5]   ;;  %v1138_v29 = vpop.f32.mrf.mxu0 }
 0x74e   :  { %1246 = dma.done.wait [#allocation5], 32  }
 0x74f   :  { %1247 = vsyncadd [#allocation5], 4294967264 }
 0x750   :  { %967 = vsyncpa [#allocation4], 1 }
 0x751   :  { %968 = vsyncpa [#allocation5], 1 }

</bundles_post_ra>
